<compile_context>
chip_gen: v6e
topology: v6e:2x2x1
jax: 0.10.0
libtpu: 0.0.40
codegen_flags: <defaults>
</compile_context>

<pallas_src>
import jax
import jax.numpy as jnp
from jax.experimental import pallas as pl
from jax.experimental.pallas import tpu as pltpu

NEG_SLOPE = 0.01  # PyTorch nn.LeakyReLU default negative_slope


def _round_up(x, m):
    return ((x + m - 1) // m) * m


# ---------------------------------------------------------------------------
# u32 -> (bf16, bf16) bit-order probe (cached Python bool, computed eagerly once).
# ---------------------------------------------------------------------------
_BF16_PAIR_LOW_FIRST = None


def _bf16_pair_low_bits_first():
    """Does XLA's u32->bf16 bitcast place the low 16 bits at minor index 0?"""
    global _BF16_PAIR_LOW_FIRST
    if _BF16_PAIR_LOW_FIRST is None:
        try:
            word = jnp.asarray(0x3F80 | (0x4000 << 16), dtype=jnp.uint32)  # bf16(1.0) | bf16(2.0)<<16
            pair = jax.lax.bitcast_convert_type(word, jnp.bfloat16)        # shape (2,)
            _BF16_PAIR_LOW_FIRST = bool(pair[0] == 1.0)
        except Exception:  # e.g. probed under jit before the cache is warm
            _BF16_PAIR_LOW_FIRST = True  # XLA's little-endian-style documented order
    return _BF16_PAIR_LOW_FIRST


# ---------------------------------------------------------------------------
# Kernel
# ---------------------------------------------------------------------------
def _make_kernel(cin, *, pack_dx, low_first, use_vpu):
    def _bf16_bits(v):
        # Round-to-nearest-even f32 -> bf16 bits, kept in the low 16 bits of a u32.
        u = pltpu.bitcast(v, jnp.uint32)
        u = u + jnp.uint32(0x7FFF) + ((u >> 16) & jnp.uint32(1))
        return u >> 16

    def kernel(x_ref, w_ref, b_ref, o_ref):
        # x_ref: (Cin, TM)         pixel axis on lanes (lane-dense loads/stores)
        # w_ref: (2, 2*Cout, Cin)  one weight slab per dx, rows ordered (co, dy)
        # b_ref: (2*Cout, 1) f32   per-row bias, rows ordered (co, dy)
        # o_ref: (2*Cout, TM) u32  packed bf16 dx-pairs   (pack_dx=True)
        #        (4*Cout, TM) f32  rows ordered (dx, co, dy)  (pack_dx=False)
        x = x_ref[...]
        b = b_ref[...]

        def contract(wmat):  # (2*Cout, Cin) @ (Cin, TM) -> (2*Cout, TM) f32
            if use_vpu:
                # Tiny Cin: skip the MXU (K would be padded 4 -> 128) and use
                # broadcast-FMAs on the VPU instead (review suggestion).
                acc = wmat[:, 0:1] * x[0:1, :].astype(jnp.float32)
                for ci in range(1, cin):
                    acc = acc + wmat[:, ci:ci + 1] * x[ci:ci + 1, :].astype(jnp.float32)
                return acc
            return jnp.dot(wmat, x, preferred_element_type=jnp.float32)

        def act(y):
            z = y + b
            return jnp.where(z > 0, z, NEG_SLOPE * z)

        z0 = act(contract(w_ref[0]))  # dx = 0 rows, ordered (co, dy)
        z1 = act(contract(w_ref[1]))  # dx = 1 rows, ordered (co, dy)

        if pack_dx:
            # Fused dx interleave: each u32 lane holds the bf16 pair
            # (out[..., 2w], out[..., 2w+1]) for one input pixel -> lane-dense u32 store.
            h0, h1 = _bf16_bits(z0), _bf16_bits(z1)
            lo, hi = (h0, h1) if low_first else (h1, h0)
            o_ref[...] = lo | (hi << 16)
        else:
            o_ref[...] = jnp.concatenate([z0, z1], axis=0).astype(o_ref.dtype)

    return kernel


# ---------------------------------------------------------------------------
# Tiling / VMEM budgeting
# ---------------------------------------------------------------------------
def _vmem_capacity_bytes():
    try:
        cap = int(getattr(pltpu.get_tpu_info(), "vmem_capacity_bytes", 0) or 0)
        if cap > 0:
            return cap
    except Exception:
        pass
    return 64 * 1024 * 1024  # conservative fallback: v7x physical VMEM


def _pick_tile(hw, cin, x_itemsize, out_rows, out_itemsize, tm_target):
    """Largest lane-aligned pixel tile fitting a generation-aware VMEM budget."""
    cap = _vmem_capacity_bytes()
    budget = int(cap * 0.40)  # ~25 MiB on v7x (64 MiB VMEM), ~51 MiB on v5e/v6e (128 MiB)
    per_lane = 2 * cin * x_itemsize + 2 * out_rows * out_itemsize  # double-buffered in + out
    fixed = 8 * out_rows * cin + 4 * out_rows + (256 << 10)        # weights + bias + slack
    tm_cap = max(128, ((budget - fixed) // per_lane) // 128 * 128)

    if hw <= 128:
        return hw, per_lane * hw + fixed, cap

    tm = min(_round_up(tm_target, 128), _round_up(hw, 128), tm_cap)
    if hw > 256:
        # Keep >= 2 pixel blocks per image: 2-TC megacore sharding + DMA/compute overlap.
        tm = min(tm, max(128, _round_up(-(-hw // 2), 128)))
    if tm >= hw:
        tm = hw  # one full block covers all pixels (legal: equals full array dim)
    return tm, per_lane * tm + fixed, cap


# ---------------------------------------------------------------------------
# Wrapper
# ---------------------------------------------------------------------------
def upsample_forward(x, weight, bias, *, out_dtype=jnp.float32,
                     tm_target=16384, use_vpu_small_cin=True):
    """ConvTranspose2d(Cin -> Cout=Cin//2, k=2, s=2) + LeakyReLU.

    x: (N, Cin, H, W) float32 or bfloat16 (pass bf16 straight from the producer;
       no wrapper-side cast is performed).
    weight: (Cin, Cout, 2, 2)  (PyTorch ConvTranspose2d layout);  bias: (Cout,).
    out_dtype: float32 (exact module semantics) or bfloat16 (recommended perf
       path: halves the dominant writeback and fuses the dx interleave in-kernel).
    Returns (N, Cout, 2H, 2W) in out_dtype.
    """
    N, Cin, H, W = x.shape
    Cout = weight.shape[1]
    HW = H * W

    pack_dx = jnp.dtype(out_dtype) == jnp.dtype(jnp.bfloat16)
    use_vpu = bool(use_vpu_small_cin) and Cin <= 8
    out_rows = 2 * Cout if pack_dx else 4 * Cout
    store_dtype = jnp.uint32 if pack_dx else jnp.dtype(out_dtype)
    x_itemsize = jnp.dtype(x.dtype).itemsize
    out_itemsize = jnp.dtype(store_dtype).itemsize

    tm, footprint, vmem_cap = _pick_tile(HW, Cin, x_itemsize, out_rows, out_itemsize, tm_target)

    # Free view of NCHW: no pad, no cast (review items 3 & 4).
    x_flat = x.reshape(N, Cin, HW)

    # (Cin, Cout, dy, dx) -> (dx, co, dy, ci) -> (2, 2*Cout, Cin): one weight slab per dx
    # so the kernel never needs strided row slices.
    w_pair = jnp.transpose(weight, (3, 1, 2, 0)).reshape(2, 2 * Cout, Cin)
    w_pair = w_pair.astype(jnp.float32 if use_vpu else x.dtype)
    b_rows = jnp.repeat(bias.astype(jnp.float32), 2).reshape(2 * Cout, 1)  # rows (co, dy)

    grid = (N, pl.cdiv(HW, tm))
    vmem_limit = min(int(vmem_cap * 0.75), int(footprint * 1.25) + (4 << 20))
    vmem_limit = max(int(vmem_limit), 8 << 20)

    kernel = _make_kernel(
        Cin, pack_dx=pack_dx,
        low_first=_bf16_pair_low_bits_first() if pack_dx else True,
        use_vpu=use_vpu)

    flops = 2 * N * HW * Cin * 4 * Cout
    # Bytes the pallas_call itself moves (input + weights/bias + output in its real
    # store dtype).  The remaining dy row shuffle is a separate XLA op.
    bytes_accessed = (N * Cin * HW * x_itemsize
                      + 8 * Cout * Cin * 4 + 2 * Cout * 4
                      + N * out_rows * HW * out_itemsize)

    y_flat = pl.pallas_call(
        kernel,
        out_shape=jax.ShapeDtypeStruct((N, out_rows, HW), store_dtype),
        grid_spec=pltpu.PrefetchScalarGridSpec(
            num_scalar_prefetch=0,
            grid=grid,
            in_specs=[
                pl.BlockSpec((None, Cin, tm), lambda n, m: (n, 0, m)),       # x (squeezed N)
                pl.BlockSpec((2, 2 * Cout, Cin), lambda n, m: (0, 0, 0)),    # weights
                pl.BlockSpec((2 * Cout, 1), lambda n, m: (0, 0)),            # bias
            ],
            out_specs=pl.BlockSpec((None, out_rows, tm), lambda n, m: (n, 0, m)),
        ),
        compiler_params=pltpu.CompilerParams(
            dimension_semantics=("parallel", "parallel"),
            vmem_limit_bytes=int(vmem_limit),
        ),
        cost_estimate=pl.CostEstimate(
            flops=int(flops), transcendentals=0, bytes_accessed=int(bytes_accessed)),
    )(x_flat, w_pair, b_rows)

    if pack_dx:
        # Rows are (co, dy); every u32 lane already holds the dx-interleaved bf16 pair,
        # so only the dy row-interleave remains: one regular u32 transpose (half the
        # bytes of the old f32 shuffle) followed by free reshapes + a bit reinterpret.
        # TODO(synk): fusing this last dy interleave needs a W-on-lanes matmul layout
        # or sublane-strided output stores; left as a single XLA pass for now.
        y = y_flat.reshape(N, Cout, 2, H, W)
        y = jnp.transpose(y, (0, 1, 3, 2, 4))               # (n, co, h, dy, w)
        y = y.reshape(N, Cout, 2 * H, W)
        y = jax.lax.bitcast_convert_type(y, jnp.bfloat16)   # (..., W, 2) = (w, dx)
        return y.reshape(N, Cout, 2 * H, 2 * W)

    # f32 (exact-semantics) path: rows are (dx, co, dy); classic pixel shuffle.
    y = y_flat.reshape(N, 2, Cout, 2, H, W)
    y = jnp.transpose(y, (0, 2, 4, 3, 5, 1))                # (n, co, h, dy, w, dx)
    return y.reshape(N, Cout, 2 * H, 2 * W).astype(out_dtype)


# ---------------------------------------------------------------------------
# Reference + self-test
# ---------------------------------------------------------------------------
def _reference(x, weight, bias):
    # Pure-JAX reference of ConvTranspose2d(k=2, s=2) + LeakyReLU.
    N, Cin, H, W = x.shape
    Cout = weight.shape[1]
    y = jnp.einsum("nihw,ioyx->nohywx", x, weight)  # (N, Cout, H, dy, W, dx)
    y = y + bias[None, :, None, None, None, None]
    y = y.reshape(N, Cout, 2 * H, 2 * W)
    return jnp.where(y > 0, y, NEG_SLOPE * y)


if __name__ == "__main__":
    key = jax.random.PRNGKey(0)
    k_x, k_w, k_b = jax.random.split(key, 3)

    N, Cin, H, W = 2, 4, 16, 16
    Cout = Cin // 2

    x = jax.random.normal(k_x, (N, Cin, H, W), dtype=jnp.float32)
    # Shapes follow nn.ConvTranspose2d(Cin, Cin // 2, kernel_size=2, stride=2).
    weight = jax.random.normal(k_w, (Cin, Cout, 2, 2), dtype=jnp.float32) * 0.25
    bias = jax.random.normal(k_b, (Cout,), dtype=jnp.float32) * 0.1

    ref = jax.block_until_ready(_reference(x, weight, bias))

    # Exact-semantics path (f32 out; Cin<=8 -> VPU broadcast-FMA contraction).
    out_f32 = jax.block_until_ready(upsample_forward(x, weight, bias))
    assert out_f32.shape == (N, Cout, 2 * H, 2 * W) and out_f32.dtype == jnp.float32
    assert jnp.allclose(out_f32, ref, atol=1e-5, rtol=1e-5)

    # Same semantics, forcing the MXU contraction path.
    out_mxu = jax.block_until_ready(
        upsample_forward(x, weight, bias, use_vpu_small_cin=False))
    assert jnp.allclose(out_mxu, ref, atol=1e-4, rtol=1e-4)

    # Recommended perf path: bf16 out with the in-kernel dx interleave (u32 lane pack).
    out_bf16 = jax.block_until_ready(
        upsample_forward(x, weight, bias, out_dtype=jnp.bfloat16))
    assert out_bf16.shape == (N, Cout, 2 * H, 2 * W) and out_bf16.dtype == jnp.bfloat16
    assert jnp.allclose(out_bf16.astype(jnp.float32), ref, atol=3e-2, rtol=3e-2)

    # bf16 activations straight from the producer (no wrapper cast), bf16 out.
    x_bf16 = x.astype(jnp.bfloat16)
    ref_b = jax.block_until_ready(_reference(x_bf16.astype(jnp.float32), weight, bias))
    out_bb = jax.block_until_ready(
        upsample_forward(x_bf16, weight, bias, out_dtype=jnp.bfloat16))
    assert jnp.allclose(out_bb.astype(jnp.float32), ref_b, atol=3e-2, rtol=3e-2)

    print("KERNEL_OK")
</pallas_src>

<mosaic_0001>
module attributes {stable_mosaic.version = 11 : i64} {
  func.func @kernel(%arg0: i32, %arg1: i32, %arg2: memref<1x4x256xf32, #tpu.memory_space<vmem>>, %arg3: memref<2x4x4xf32, #tpu.memory_space<vmem>>, %arg4: memref<4x1xf32, #tpu.memory_space<vmem>>, %arg5: memref<1x8x256xf32, #tpu.memory_space<vmem>>) attributes {dimension_semantics = [#tpu.dimension_semantics<parallel>, #tpu.dimension_semantics<parallel>], iteration_bounds = array<i64: 2, 1>, scalar_prefetch = 0 : i64, scratch_operands = 0 : i64, tpu.core_type = #tpu.core_type<tc>, window_params = [{transform_indices = @transform_0, window_bounds = array<i64: 1, 4, 256>}, {pipeline_mode = #tpu.pipeline_mode<synchronous>, transform_indices = @transform_1, window_bounds = array<i64: 2, 4, 4>}, {pipeline_mode = #tpu.pipeline_mode<synchronous>, transform_indices = @transform_2, window_bounds = array<i64: 4, 1>}, {transform_indices = @transform_3, window_bounds = array<i64: 1, 8, 256>}]} {
    %c0 = arith.constant 0 : index
    %c0_0 = arith.constant 0 : index
    %c0_1 = arith.constant 0 : index
    %0 = vector.load %arg2[%c0, %c0_0, %c0_1] : memref<1x4x256xf32, #tpu.memory_space<vmem>>, vector<1x4x256xf32>
    %1 = vector.shape_cast %0 : vector<1x4x256xf32> to vector<4x256xf32>
    %c0_2 = arith.constant 0 : index
    %c0_3 = arith.constant 0 : index
    %2 = vector.load %arg4[%c0_2, %c0_3] : memref<4x1xf32, #tpu.memory_space<vmem>>, vector<4x1xf32>
    %c0_4 = arith.constant 0 : index
    %c0_5 = arith.constant 0 : index
    %c0_6 = arith.constant 0 : index
    %3 = vector.load %arg3[%c0_4, %c0_5, %c0_6] : memref<2x4x4xf32, #tpu.memory_space<vmem>>, vector<1x4x4xf32>
    %4 = vector.shape_cast %3 : vector<1x4x4xf32> to vector<4x4xf32>
    %5 = vector.extract_strided_slice %4 {offsets = [0, 0], sizes = [4, 1], strides = [1, 1]} : vector<4x4xf32> to vector<4x1xf32>
    %6 = vector.extract_strided_slice %1 {offsets = [0, 0], sizes = [1, 256], strides = [1, 1]} : vector<4x256xf32> to vector<1x256xf32>
    %7 = vector.broadcast %5 : vector<4x1xf32> to vector<4x256xf32>
    %8 = vector.broadcast %6 : vector<1x256xf32> to vector<4x256xf32>
    %9 = arith.mulf %7, %8 : vector<4x256xf32>
    %10 = vector.extract_strided_slice %4 {offsets = [0, 1], sizes = [4, 1], strides = [1, 1]} : vector<4x4xf32> to vector<4x1xf32>
    %11 = vector.extract_strided_slice %1 {offsets = [1, 0], sizes = [1, 256], strides = [1, 1]} : vector<4x256xf32> to vector<1x256xf32>
    %12 = vector.broadcast %10 : vector<4x1xf32> to vector<4x256xf32>
    %13 = vector.broadcast %11 : vector<1x256xf32> to vector<4x256xf32>
    %14 = arith.mulf %12, %13 : vector<4x256xf32>
    %15 = arith.addf %9, %14 : vector<4x256xf32>
    %16 = vector.extract_strided_slice %4 {offsets = [0, 2], sizes = [4, 1], strides = [1, 1]} : vector<4x4xf32> to vector<4x1xf32>
    %17 = vector.extract_strided_slice %1 {offsets = [2, 0], sizes = [1, 256], strides = [1, 1]} : vector<4x256xf32> to vector<1x256xf32>
    %18 = vector.broadcast %16 : vector<4x1xf32> to vector<4x256xf32>
    %19 = vector.broadcast %17 : vector<1x256xf32> to vector<4x256xf32>
    %20 = arith.mulf %18, %19 : vector<4x256xf32>
    %21 = arith.addf %15, %20 : vector<4x256xf32>
    %22 = vector.extract_strided_slice %4 {offsets = [0, 3], sizes = [4, 1], strides = [1, 1]} : vector<4x4xf32> to vector<4x1xf32>
    %23 = vector.extract_strided_slice %1 {offsets = [3, 0], sizes = [1, 256], strides = [1, 1]} : vector<4x256xf32> to vector<1x256xf32>
    %24 = vector.broadcast %22 : vector<4x1xf32> to vector<4x256xf32>
    %25 = vector.broadcast %23 : vector<1x256xf32> to vector<4x256xf32>
    %26 = arith.mulf %24, %25 : vector<4x256xf32>
    %27 = arith.addf %21, %26 : vector<4x256xf32>
    %28 = vector.broadcast %2 : vector<4x1xf32> to vector<4x256xf32>
    %29 = arith.addf %27, %28 : vector<4x256xf32>
    %cst = arith.constant 0.000000e+00 : f32
    %30 = vector.broadcast %cst : f32 to vector<4x256xf32>
    %31 = arith.cmpf ogt, %29, %30 : vector<4x256xf32>
    %cst_7 = arith.constant 0.00999999977 : f32
    %32 = vector.broadcast %cst_7 : f32 to vector<4x256xf32>
    %33 = arith.mulf %32, %29 : vector<4x256xf32>
    %34 = arith.select %31, %29, %33 : vector<4x256xi1>, vector<4x256xf32>
    %c1 = arith.constant 1 : index
    %c0_8 = arith.constant 0 : index
    %c0_9 = arith.constant 0 : index
    %35 = vector.load %arg3[%c1, %c0_8, %c0_9] : memref<2x4x4xf32, #tpu.memory_space<vmem>>, vector<1x4x4xf32>
    %36 = vector.shape_cast %35 : vector<1x4x4xf32> to vector<4x4xf32>
    %37 = vector.extract_strided_slice %36 {offsets = [0, 0], sizes = [4, 1], strides = [1, 1]} : vector<4x4xf32> to vector<4x1xf32>
    %38 = vector.extract_strided_slice %1 {offsets = [0, 0], sizes = [1, 256], strides = [1, 1]} : vector<4x256xf32> to vector<1x256xf32>
    %39 = vector.broadcast %37 : vector<4x1xf32> to vector<4x256xf32>
    %40 = vector.broadcast %38 : vector<1x256xf32> to vector<4x256xf32>
    %41 = arith.mulf %39, %40 : vector<4x256xf32>
    %42 = vector.extract_strided_slice %36 {offsets = [0, 1], sizes = [4, 1], strides = [1, 1]} : vector<4x4xf32> to vector<4x1xf32>
    %43 = vector.extract_strided_slice %1 {offsets = [1, 0], sizes = [1, 256], strides = [1, 1]} : vector<4x256xf32> to vector<1x256xf32>
    %44 = vector.broadcast %42 : vector<4x1xf32> to vector<4x256xf32>
    %45 = vector.broadcast %43 : vector<1x256xf32> to vector<4x256xf32>
    %46 = arith.mulf %44, %45 : vector<4x256xf32>
    %47 = arith.addf %41, %46 : vector<4x256xf32>
    %48 = vector.extract_strided_slice %36 {offsets = [0, 2], sizes = [4, 1], strides = [1, 1]} : vector<4x4xf32> to vector<4x1xf32>
    %49 = vector.extract_strided_slice %1 {offsets = [2, 0], sizes = [1, 256], strides = [1, 1]} : vector<4x256xf32> to vector<1x256xf32>
    %50 = vector.broadcast %48 : vector<4x1xf32> to vector<4x256xf32>
    %51 = vector.broadcast %49 : vector<1x256xf32> to vector<4x256xf32>
    %52 = arith.mulf %50, %51 : vector<4x256xf32>
    %53 = arith.addf %47, %52 : vector<4x256xf32>
    %54 = vector.extract_strided_slice %36 {offsets = [0, 3], sizes = [4, 1], strides = [1, 1]} : vector<4x4xf32> to vector<4x1xf32>
    %55 = vector.extract_strided_slice %1 {offsets = [3, 0], sizes = [1, 256], strides = [1, 1]} : vector<4x256xf32> to vector<1x256xf32>
    %56 = vector.broadcast %54 : vector<4x1xf32> to vector<4x256xf32>
    %57 = vector.broadcast %55 : vector<1x256xf32> to vector<4x256xf32>
    %58 = arith.mulf %56, %57 : vector<4x256xf32>
    %59 = arith.addf %53, %58 : vector<4x256xf32>
    %60 = vector.broadcast %2 : vector<4x1xf32> to vector<4x256xf32>
    %61 = arith.addf %59, %60 : vector<4x256xf32>
    %cst_10 = arith.constant 0.000000e+00 : f32
    %62 = vector.broadcast %cst_10 : f32 to vector<4x256xf32>
    %63 = arith.cmpf ogt, %61, %62 : vector<4x256xf32>
    %cst_11 = arith.constant 0.00999999977 : f32
    %64 = vector.broadcast %cst_11 : f32 to vector<4x256xf32>
    %65 = arith.mulf %64, %61 : vector<4x256xf32>
    %66 = arith.select %63, %61, %65 : vector<4x256xi1>, vector<4x256xf32>
    %67 = tpu.concatenate %34, %66 in 0 : vector<4x256xf32>, vector<4x256xf32> -> vector<8x256xf32>
    %c0_12 = arith.constant 0 : index
    %c0_13 = arith.constant 0 : index
    %c0_14 = arith.constant 0 : index
    %68 = vector.load %arg5[%c0_12, %c0_13, %c0_14] : memref<1x8x256xf32, #tpu.memory_space<vmem>>, vector<1x8x256xf32>
    %69 = vector.shape_cast %68 : vector<1x8x256xf32> to vector<8x256xf32>
    %70 = vector.shape_cast %67 : vector<8x256xf32> to vector<1x8x256xf32>
    tpu.vector_store %arg5[%c0_12, %c0_13, %c0_14], %70 {strides = array<i32>} : memref<1x8x256xf32, #tpu.memory_space<vmem>>, vector<1x8x256xf32>,
    return
  }
  func.func @transform_0(%arg0: i32, %arg1: i32) -> (i32, i32, i32) {
    %c0_i32 = arith.constant 0 : i32
    %c0_i32_0 = arith.constant 0 : i32
    return %arg0, %c0_i32, %arg1 : i32, i32, i32
  }
  func.func @transform_1(%arg0: i32, %arg1: i32) -> (i32, i32, i32) {
    %c0_i32 = arith.constant 0 : i32
    %c0_i32_0 = arith.constant 0 : i32
    %c0_i32_1 = arith.constant 0 : i32
    %c0_i32_2 = arith.constant 0 : i32
    return %c0_i32, %c0_i32_0, %c0_i32_1 : i32, i32, i32
  }
  func.func @transform_2(%arg0: i32, %arg1: i32) -> (i32, i32) {
    %c0_i32 = arith.constant 0 : i32
    %c0_i32_0 = arith.constant 0 : i32
    %c0_i32_1 = arith.constant 0 : i32
    return %c0_i32, %c0_i32_0 : i32, i32
  }
  func.func @transform_3(%arg0: i32, %arg1: i32) -> (i32, i32, i32) {
    %c0_i32 = arith.constant 0 : i32
    %c0_i32_0 = arith.constant 0 : i32
    return %arg0, %c0_i32, %arg1 : i32, i32, i32
  }
}

</mosaic_0001>

<bundles_post_ra>
// kernel: tpu_custom_call.1
= control target key start
LH: loop header
LB: loop body
LE: loop exit
PB: predicated region body
PF: predicated region fallthrough
CT: control target
= control target key end

     0   :  { %8 = vsyncpa [#allocation3], 0  ;;  %s969_s0 = inlined_call_operand.hbm [shape: f32[2,4,256], index: 0, kind: input, shape index: {}]   ;;  %s970_s1 = inlined_call_operand.hbm [shape: f32[2,4,4], index: 1, kind: input, shape index: {}]   ;;  %s971_s2 = inlined_call_operand.vmem [shape: f32[4,1], index: 2, kind: input, shape index: {}]   ;;  %s972_s3 = inlined_call_operand.hbm [shape: f32[2,8,256], index: 3, kind: output, shape index: {}]  }
   0x1   :  { %10 = vsyncpa [#allocation3 + $0x1], 0 }
   0x2   :  { %11 = vsyncpa [#allocation6], 0 }
   0x3   :  { %12 = vsyncpa [#allocation4], 0 }
   0x4   :  { %14 = vsyncpa [#allocation4 + $0x1], 0  ;;  %s781_s12 = smov 0   ;;  %s783_s13 = smov 0  }
   0x5   :  { %s785_s14 = smov 0   ;;  %s787_s15 = smov 0  }
   0x6   :  { %s789_s16 = smov 0   ;;  %s791_s17 = smov 0  }
   0x7 LB: > { %s505_s18 = sadd.s32 4294967295, %s750_s17   ;;  %s506_s19 = sadd.s32 4294967294, %s750_s17   ;;  %s750_s17 = sphi %s791_s17, %s20_s17   ;;  %s746_s16 = sphi %s789_s16, %s990_s16   ;;  %s742_s15 = sphi %s787_s15, %s989_s15   ;;  %s738_s14 = sphi %s785_s14, %s988_s14   ;;  %s734_s13 = sphi %s783_s13, %s987_s13   ;;  %s730_s12 = sphi %s781_s12, %s986_s12  }
   0x8   : > { %p54_p0 = scmp.ne.s32.totalorder %s734_s13, %s730_s12  ;;  %p815_p1 = scmp.eq.s32.totalorder %s505_s18, 0 }
   0x9   : > { %p819_p2 = scmp.eq.s32.totalorder %s505_s18, 1  ;;  %p128_p3 = scmp.eq.s32.totalorder %s506_s19, 1 }
   0xa   : > { %p825_p4 = por %p815_p1, %p54_p0  ;;  %p507_p5 = scmp.ge.s32.totalorder %s750_s17, 1 }
   0xb   : > { %p830_p6 = por %p128_p3, %p54_p0  ;;  %p135_p7 = scmp.lt.s32.totalorder %s750_s17, 3 }
   0xc   : > { %s976_s22 = scalar_select %p825_p4, 1, 0 }
   0xd   : > { %s977_s23 = scalar_select %p830_p6, 1, 0 }
   0xe   : > { %p835_p8 = pnand %p507_p5, %p135_p7  ;;  %s752_s25 = smov [#allocation5]  }
   0xf   : > { %s147_s26 = sshll.u32 %s752_s25, 4  ;;  %s32_s28 = sadd.s32 1, %s746_s16  ;;  %s148_s26 = int_to_ptr.vmem [resolvable:$true] %s147_s26 }
  0x10   : > { %p532_p9 = pneg %p835_p8  ;;  %s623_s29 = scalar_lea.vmem %s148_s26, 128 }
  0x11   : > { %p624_p13 = scmp.ne.s32.totalorder %s148_s26, %s623_s29  ;;  %p631_p5 = scmp.lt.s32.totalorder %s148_s26, %s148_s26 }
  0x12   : > { %p844_p11 = pnand %p532_p9, %p815_p1  ;;  %p632_p7 = scmp.lt.s32.totalorder %s623_s29, %s623_s29 }
  0x14   : > { %p614_p12 = pneg %p844_p11  ;;  %p633_p6 = por %p632_p7, %p631_p5 }
  0x16   : > { %p626_p0 = pnand %p624_p13, %p614_p12 }
  0x18   : > { %p627_p3 = pneg %p626_p0 }
  0x1a   : > { %p634_p4 = pnand %p633_p6, %p627_p3 }
  0x1c   : > { %637 = shalt.err (!%p634_p4)
}
  0x1d   : > { %s753_s30 = smov 64   ;;  %s754_s4 = smov 4  }
  0x1e   : > { %535 = dma.hbm_to_vmem [thread:$0]  (!%p844_p11), %s970_s1, 128, %s148_s26, [#allocation6], %s753_s30, %s753_s30, %s754_s4  }
  0x1f   : > { %p34_p6 = scmp.ge.s32.totalorder %s32_s28, 2  ;;  %s41_s7 = sadd.s32 1, %s738_s14 }
  0x20   : > { %p48_p4 = scmp.ne.s32.totalorder %s738_s14, %s734_s13  ;;  %p49_p9 = scmp.eq.s32.totalorder %s750_s17, 0 }
  0x21   : > { %s992_s28 = smov (%p34_p6, %s32_s28), 0  ;;  %p545_p0 = scmp.lt.s32.totalorder %s750_s17, 2 }
  0x22   : > { %p862_p12 = por %p49_p9, %p48_p4  ;;  %p868_p13 = por %p819_p2, %p48_p4 }
  0x23   : > { %s36_s10 = ssub.s32 %s746_s16, %s992_s28  ;;  %s164_s11 = sand.u32 1, %s738_s14  }
  0x24   : > { %p39_p11 = scmp.eq.s32.totalorder %s36_s10, 0  ;;  %s510_s18 = sshll.u32 %s164_s11, 3 }
  0x25   : > { %s522_s25 = sshll.u32 %s746_s16, 7  ;;  %s168_s30 = scalar_lea.vmem [#allocation2], %s510_s18 }
  0x26   : > { %s877_s19 = scalar_select %p39_p11, %s738_s14, %s41_s7  }
  0x27   : > { %s176_s29 = scalar_lea.hbm %s969_s0, %s522_s25  ;;  %s178_s4 = sshll.u32 %s168_s30, 4  ;;  %s179_s4 = int_to_ptr.vmem [resolvable:$true] %s178_s4 }
  0x28   : > { %p885_p2 = pnand %p545_p0, %p862_p12  ;;  %s165_s5 = scalar_lea.sflag [#allocation3], %s164_s11 }
  0x29   : > { %s651_s6 = scalar_lea.vmem %s179_s4, 128  ;;  %s755_s7 = smov [#allocation2]  }
  0x2a   : > { %p640_p3 = pneg %p885_p2  ;;  %p652_p5 = scmp.ne.s32.totalorder %s179_s4, %s651_s6 }
  0x2b   : > { %s656_s10 = sshll.u32 %s755_s7, 4  ;;  %s657_s10 = int_to_ptr.vmem [resolvable:$false] %s656_s10 }
  0x2c   : > { %p654_p7 = pnand %p652_p5, %p640_p3  ;;  %s658_s25 = scalar_lea.vmem %s657_s10, 256 }
  0x2d   : > { %p659_p4 = scmp.lt.s32.totalorder %s179_s4, %s657_s10  ;;  %p660_p9 = scmp.lt.s32.totalorder %s658_s25, %s651_s6 }
  0x2e   : > { %p655_p6 = pneg %p654_p7 }
  0x2f   : > { %p661_p11 = por %p660_p9, %p659_p4 }
  0x31   : > { %p662_p10 = pnand %p661_p11, %p655_p6 }
  0x33   : > { %665 = shalt.err (!%p662_p10)
}
  0x34   : > { %539 = dma.hbm_to_vmem [thread:$0]  (!%p885_p2), %s176_s29, 128, %s179_s4, %s165_s5  }
  0x35   : > { %187 = sbr.rel (%p835_p8) target bundleno = 229 (0xe5), region = 32  ;;  %s896_s8 = sand.u32 (!%p835_p8), 1, %s734_s13  }
  0x36   : > { %s514_s11 = sshll.u32 (!%p835_p8), %s896_s8, 3  ;;  %s190_s18 = scalar_lea.sflag (!%p835_p8), [#allocation3], %s896_s8 }
  0x37   : > { %s900_s26 = scalar_lea.vmem (!%p835_p8), [#allocation2], %s514_s11  ;;  %p983_p12 = scmp.ne.s32.totalorder (!%p835_p8), %s976_s22, 0 }
  0x3a   : > { %717 = dma.done.wait (%p983_p12), %s190_s18, 128  }
  0x3b   : > { %719 = vsyncadd (%p983_p12), %s190_s18, 4294967168 }
  0x3c   : > { %721 = dma.done.wait (%p815_p1), [#allocation6], 128  }
  0x3d   : > { %723 = vsyncadd (%p815_p1), [#allocation6], 4294967168  ;;  %v756_v0 = vmov 0   ;;  %v343_v1 = vld [vmem:[#allocation5 + $0x4] sm:$0xf]  ;;  %v757_v3 = vmov 1   ;;  %v231_v7 = vlaneseq }
  0x3e   : > { %605 = vset.pattern.permute.xlu1 %v756_v0  ;;  %603 = vset.pattern.permute.xlu0 %v756_v0  ;;  %v224_v2 = vld [vmem:[#allocation5] sm:$0xf]  ;;  %v758_v4 = vmov 2   ;;  %v223_v5 = vld [vmem:[%s971_s2] sm:$0xf]  ;;  %v759_v6 = vmov 3  }
  0x3f   : > { %346 = vperm.xlu0 %603, %v343_v1   ;;  %227 = vperm.xlu1 %605, %v224_v2   ;;  %v232_v8 = vshrl.u32 %v231_v7, 7  ;;  %v222_v14 = vld [vmem:[%s900_s26] sm:$0xff]  ;;  %s516_s24 = sshll.u32 %s896_s8, 4  ;;  %vm389_vm2 = vcmask 1043456   ;;  %s523_s27 = sshll.u32 %s742_s15, 8 }
  0x40   : > { %s219_s29 = scalar_lea.vmem [#allocation7], %s516_s24  ;;  %s919_s5 = scalar_lea.hbm %s972_s3, %s523_s27 }
  0x41   : > { %v257_v9 = vsub.s32 1, %v232_v8  ;;  %v261_v10 = vsub.s32 5, %v232_v8  ;;  %v233_v11 = vsub.s32 0, %v232_v8  ;;  %v237_v12 = vsub.s32 4, %v232_v8  ;;  %s411_s30 = sshll.u32 %s219_s29, 4  ;;  %s395_s15 = scalar_lea.sflag [#allocation4], %s896_s8  ;;  %s921_s30 = int_to_ptr.vmem [resolvable:$true] %s411_s30 }
  0x42   : > { %v283_v16 = vsub.s32 2, %v232_v8  ;;  %v287_v17 = vsub.s32 6, %v232_v8  ;;  %v309_v24 = vsub.s32 3, %v232_v8  ;;  %v313_v25 = vsub.s32 7, %v232_v8  ;;  %s666_s6 = scalar_lea.vmem %s921_s30, 256  ;;  %s760_s7 = smov [#allocation7]  }
  0x43   : > { %604 = vset.pattern.permute.xlu0 %v757_v3  ;;  %606 = vset.pattern.permute.xlu1 %v757_v3  ;;  %v258_v18 = vrot.slane %v222_v14, %v257_v9  ;;  %v262_v19 = vrot.slane %v222_v14, %v261_v10  ;;  %v234_v20 = vrot.slane %v222_v14, %v233_v11  ;;  %p667_p1 = scmp.ne.s32.totalorder %s921_s30, %s666_s6  ;;  %s670_s10 = sshll.u32 %s760_s7, 4  ;;  %s671_s10 = int_to_ptr.vmem [resolvable:$false] %s670_s10 }
  0x44   : > { %352 = vperm.xlu0 %604, %v343_v1   ;;  %252 = vperm.xlu1 %606, %v224_v2   ;;  %v238_v21 = vrot.slane %v222_v14, %v237_v12  ;;  %v284_v22 = vrot.slane %v222_v14, %v283_v16  ;;  %v288_v23 = vrot.slane %v222_v14, %v287_v17  ;;  %s672_s25 = scalar_lea.vmem %s671_s10, 512  ;;  %p673_p0 = scmp.lt.s32.totalorder %s921_s30, %s671_s10 }
  0x45   : > { %v268_v27 = vrot.slane %v258_v18, %v257_v9  ;;  %v272_v28 = vrot.slane %v262_v19, %v257_v9  ;;  %v244_v30 = vrot.slane %v234_v20, %v233_v11  ;;  %v310_v34 = vrot.slane %v222_v14, %v309_v24  ;;  %p668_p8 = pnand %p667_p1, %p868_p13  ;;  %p674_p2 = scmp.lt.s32.totalorder %s672_s25, %s666_s6 }
  0x46   : > { %v248_v31 = vrot.slane %v238_v21, %v233_v11  ;;  %v294_v32 = vrot.slane %v284_v22, %v283_v16  ;;  %v298_v33 = vrot.slane %v288_v23, %v283_v16  ;;  %v314_v35 = vrot.slane %v222_v14, %v313_v25 }
  0x47   : > { %v320_v44 = vrot.slane %v310_v34, %v309_v24  ;;  %p669_p10 = pneg %p668_p8  ;;  %p675_p3 = por %p674_p2, %p673_p0 }
  0x48   : > { %608 = vset.pattern.permute.xlu0 %v758_v4  ;;  %607 = vset.pattern.permute.xlu1 %v758_v4  ;;  %v324_v45 = vrot.slane %v314_v35, %v309_v24 }
  0x49   : > { %278 = vperm.xlu0 %608, %v224_v2   ;;  %360 = vperm.xlu1 %607, %v343_v1   ;;  %p676_p5 = pnand %p675_p3, %p669_p10 }
  0x4d   : > { %609 = vset.pattern.permute.xlu1 %v759_v6  ;;  %610 = vset.pattern.permute.xlu0 %v756_v0 }
  0x4e   : > { %368 = vperm.xlu1 %609, %v343_v1   ;;  %331 = vperm.xlu0 %610, %v223_v5  }
  0x52   : > { %304 = vperm.xlu1 %609, %v224_v2   ;;  %611 = vset.pattern.permute.xlu0 %v759_v6 }
  0xba   : > { %v228_v13 = vpop.permute.xlu1 %227  ;;  %v347_v15 = vpop.permute.xlu0 %346 }
  0xbb   : > { %v349_v36 = vmul.f32 %v347_v15, %v244_v30  ;;  %v350_v37 = vmul.f32 %v347_v15, %v248_v31  ;;  %v249_v50 = vmul.f32 %v244_v30, %v228_v13  ;;  %v250_v51 = vmul.f32 %v248_v31, %v228_v13 }
  0xbf   : > { %v253_v26 = vpop.permute.xlu1 %252  ;;  %v353_v29 = vpop.permute.xlu0 %352 }
  0xc0   : > { %v355_v38 = vmul.f32 %v353_v29, %v268_v27  ;;  %v356_v39 = vmul.f32 %v353_v29, %v272_v28  ;;  %v273_v46 = vmul.f32 %v268_v27, %v253_v26  ;;  %v274_v47 = vmul.f32 %v272_v28, %v253_v26 }
  0xc2   : > { %v357_v48 = vadd.f32 %v355_v38, %v349_v36  ;;  %v358_v49 = vadd.f32 %v356_v39, %v350_v37  ;;  %v275_v59 = vadd.f32 %v273_v46, %v249_v50  ;;  %v276_v60 = vadd.f32 %v274_v47, %v250_v51 }
  0xc4   : > { %v361_v40 = vpop.permute.xlu1 %360  ;;  %v279_v41 = vpop.permute.xlu0 %278 }
  0xc5   : > { %v363_v42 = vmul.f32 %v361_v40, %v294_v32  ;;  %v364_v43 = vmul.f32 %v361_v40, %v298_v33  ;;  %v299_v52 = vmul.f32 %v294_v32, %v279_v41  ;;  %v300_v53 = vmul.f32 %v298_v33, %v279_v41 }
  0xc7   : > { %v365_v55 = vadd.f32 %v363_v42, %v357_v48  ;;  %v366_v56 = vadd.f32 %v364_v43, %v358_v49  ;;  %v301_v0 = vadd.f32 %v299_v52, %v275_v59  ;;  %v302_v1 = vadd.f32 %v300_v53, %v276_v60 }
  0xc9   : > { %v369_v54 = vpop.permute.xlu1 %368  ;;  %v332_v61 = vpop.permute.xlu0 %331 }
  0xca   : > { %v371_v57 = vmul.f32 %v369_v54, %v320_v44  ;;  %v372_v58 = vmul.f32 %v369_v54, %v324_v45 }
  0xcc   : > { %v373_v62 = vadd.f32 %v371_v57, %v365_v55  ;;  %v374_v63 = vadd.f32 %v372_v58, %v366_v56 }
  0xcd   : > { %v305_v2 = vpop.permute.xlu1 %304 }
  0xce   : > { %v325_v3 = vmul.f32 %v320_v44, %v305_v2  ;;  %v326_v4 = vmul.f32 %v324_v45, %v305_v2  ;;  %v375_v5 = vadd.f32 %v373_v62, %v332_v61  ;;  %v376_v6 = vadd.f32 %v374_v63, %v332_v61 }
  0xd0   : > { %v327_v7 = vadd.f32 %v325_v3, %v301_v0  ;;  %v328_v8 = vadd.f32 %v326_v4, %v302_v1  ;;  %vm377_vm0 = vcmp.gt.f32.partialorder %v375_v5, 0.0  ;;  %vm378_vm1 = vcmp.gt.f32.partialorder %v376_v6, 0.0 }
  0xd1   : > { %v379_v9 = vmul.f32 0.01, %v375_v5  ;;  %v380_v10 = vmul.f32 0.01, %v376_v6 }
  0xd2   : > { %v334_v11 = vadd.f32 %v332_v61, %v327_v7  ;;  %v335_v12 = vadd.f32 %v332_v61, %v328_v8 }
  0xd3   : > { %v381_v13 = vsel %vm377_vm0, %v375_v5, %v379_v9  ;;  %v382_v14 = vsel %vm378_vm1, %v376_v6, %v380_v10 }
  0xd4   : > { %vm336_vm3 = vcmp.gt.f32.partialorder %v334_v11, 0.0  ;;  %vm337_vm4 = vcmp.gt.f32.partialorder %v335_v12, 0.0  ;;  %v338_v15 = vmul.f32 0.01, %v334_v11  ;;  %v339_v16 = vmul.f32 0.01, %v335_v12 }
  0xd5   : > { %v385_v17 = vrot.slane %v381_v13, 4  ;;  %v386_v18 = vrot.slane %v382_v14, 4 }
  0xd6   : > { %v340_v19 = vsel %vm336_vm3, %v334_v11, %v338_v15  ;;  %v341_v20 = vsel %vm337_vm4, %v335_v12, %v339_v16 }
  0xd7   : > { %v390_v21 = vsel %vm389_vm2, %v340_v19, %v385_v17  ;;  %v391_v22 = vsel %vm389_vm2, %v341_v20, %v386_v18 }
  0xd8   : > { %392 = vst [vmem:[%s219_s29] sm:$0xff] %v390_v21  ;;  %393 = vst [vmem:[%s219_s29 + $0x8] sm:$0xff] %v391_v22 }
  0xd9   : > { %679 = shalt.err (!%p676_p5)
}
  0xda   : > { %s680_s11 = scalar_lea.hbm %s919_s5, 256  ;;  %s684_s26 = scalar_lea.hbm %s972_s3, 512 }
  0xdb   : > { %p681_p7 = scmp.ne.s32.totalorder %s919_s5, %s680_s11  ;;  %p685_p9 = scmp.lt.s32.totalorder %s919_s5, %s972_s3 }
  0xdc   : > { %p686_p11 = scmp.lt.s32.totalorder %s684_s26, %s680_s11 }
  0xdd   : > { %p682_p6 = pnand %p681_p7, %p868_p13 }
  0xde   : > { %p687_p12 = por %p686_p11, %p685_p9 }
  0xdf   : > { %p683_p4 = pneg %p682_p6 }
  0xe1   : > { %p688_p1 = pnand %p687_p12, %p683_p4 }
  0xe3   : > { %691 = shalt.err (!%p688_p1)
}
  0xe4   : > { %530 = dma.vmem_to_hbm [thread:$0]  (%p868_p13), %s921_s30, 256, %s919_s5, %s395_s15  }
  0xe5 PF: > { %s423_s24 = sand.u32 1, %s730_s12   ;;  %p984_p8 = scmp.ne.s32.totalorder %s977_s23, 0 }
  0xe6   : > { %p985_p10 = scmp.ge.s32.totalorder %s750_s17, 2  ;;  %s424_s27 = scalar_lea.sflag [#allocation4], %s423_s24 }
  0xe8   : > { %p541_p0 = pnand %p985_p10, %p984_p8 }
  0xea   : > { %p542_p2 = pneg %p541_p0 }
  0xec   : > { %725 = dma.done.wait (%p542_p2), %s424_s27, 256  }
  0xed   : > { %727 = vsyncadd (%p542_p2), %s424_s27, 4294967040  ;;  %s20_s17 = sadd.s32 1, %s750_s17   ;;  %s986_s12 = smov %s734_s13 }
  0xee   : > { %p17_p3 = scmp.ge.s32.totalorder %s20_s17, 4   ;;  %s987_s13 = smov %s738_s14 }
  0xef   : > { %s988_s14 = smov %s877_s19  ;;  %s989_s15 = smov %s746_s16 }
  0xf0   : > { %s990_s16 = smov %s992_s28  ;;  %19 = sbr.rel (!%p17_p3) target bundleno = 7 (0x7), region = 82 }
  0xf5   :  { %429 = vsyncpa [#allocation3], 1 }
  0xf6   :  { %431 = vsyncpa [#allocation3 + $0x1], 1 }
  0xf7   :  { %432 = vsyncpa [#allocation6], 1 }
  0xf8   :  { %433 = vsyncpa [#allocation4], 1 }
  0xf9   :  { %435 = vsyncpa [#allocation4 + $0x1], 1 }

</bundles_post_ra>
